<compile_context>
chip_gen: v6e
topology: v6e:2x2x1
jax: 0.10.0
libtpu: 0.0.40
codegen_flags: <defaults>
</compile_context>

<pallas_src>
import functools
import math

import jax
import jax.numpy as jnp
from jax import lax
from jax.experimental import pallas as pl
from jax.experimental.pallas import tpu as pltpu


_CHUNK = 512       # inner vreg chunk (lanes): (HID=32, 512) f32 == 16 vregs
_TP_MAX = 32768    # max pixels per grid step (~1 MiB HBM in+out at C=4, f32)


def _round_up(x, m):
    return ((x + m - 1) // m) * m


def _pick_pixel_tile(P, batch):
    """Pick (TP, CHUNK): lane-dense pixel tile per grid step + inner chunk."""
    if P <= _CHUNK:
        # Single chunk; block last dim == full array dim is always legal.
        return P, P
    tp = min(_TP_MAX, _round_up(P, _CHUNK))
    if batch == 1 and P > 2 * _CHUNK:
        # Keep >= 2 pixel-grid steps so both v7x TensorCores get work.
        tp = min(tp, max(_CHUNK, _round_up(pl.cdiv(P, 2), _CHUNK)))
    return tp, _CHUNK


def _score_kernel(x_ref, bias_ref, w1t_ref, w2t_ref, b2_ref, o_ref,
                  *, chunk, n_chunks):
    # x_ref:    (1, C, TP)   channel-major pixel tile of one batch element
    # bias_ref: (1, HID, 1)  per-batch combined bias (b1 + time embedding)
    # w1t_ref:  (HID, C)     first-layer weights, transposed
    # w2t_ref:  (C, HID)     second-layer weights, transposed
    # b2_ref:   (C, 1)       output bias
    # o_ref:    (1, C, TP)
    HID, C = w1t_ref.shape
    w1t = w1t_ref[...]                                           # (HID, C)
    w2t = w2t_ref[...]                                           # (C, HID)
    # Hoist lane broadcasts out of the chunk loop (no CSE of broadcast_in_dim).
    bias_b = jnp.broadcast_to(bias_ref[0], (HID, chunk))          # (HID, chunk)
    b2_b = jnp.broadcast_to(b2_ref[...], (C, chunk))              # (C, chunk)

    def compute(i):
        start = pl.multiple_of(i * chunk, 128)
        x = x_ref[0, :, pl.ds(start, chunk)]                      # (C, chunk)
        h = jnp.dot(w1t, x, preferred_element_type=jnp.float32)   # (HID, chunk)
        h = jnp.tanh(h + bias_b)
        y = jnp.dot(w2t, h, preferred_element_type=jnp.float32)   # (C, chunk)
        o_ref[0, :, pl.ds(start, chunk)] = (y + b2_b).astype(o_ref.dtype)

    if n_chunks == 1:
        compute(0)
    else:
        def body(i, carry):
            compute(i)
            return carry
        lax.fori_loop(0, n_chunks, body, 0, unroll=(n_chunks <= 8))


def score_estimator_forward(x_nchw, t, params):
    """Concrete UnconditionalScoreEstimator.forward(x_t, t).

    x_nchw: (B, C, H, W) float32
    t:      (B,) float32
    returns score with shape (B, C, H, W).
    """
    w1, b1, w2, b2, wt, bt = (
        params["w1"], params["b1"], params["w2"], params["b2"],
        params["wt"], params["bt"],
    )
    B, C, H, W = x_nchw.shape
    P = H * W
    HID = w1.shape[1]

    # ---- glue: Fourier time embedding, folded with b1 into one bias --------
    half = wt.shape[0] // 2
    freqs = jnp.exp(-math.log(10000.0) * jnp.arange(half, dtype=jnp.float32) / half)
    ang = t[:, None] * freqs[None, :]                                   # (B, half)
    fourier = jnp.concatenate([jnp.sin(ang), jnp.cos(ang)], axis=-1)    # (B, 2*half)
    bias = (fourier @ wt + bt + b1).reshape(B, HID, 1)                  # (B, HID, 1)

    # ---- glue: channel-major view; no transposes, reshape is free ----------
    x_rows = x_nchw.reshape(B, C, P)                                    # (B, C, P)
    w1t = w1.T                                                          # (HID, C)
    w2t = w2.T                                                          # (C, HID)
    b2c = b2.reshape(C, 1)                                              # (C, 1)

    TP, chunk = _pick_pixel_tile(P, B)
    n_chunks = TP // chunk
    grid = (B, pl.cdiv(P, TP))                                          # masked last block

    # VMEM budget: in + out blocks, double-buffered (sublane-padded C -> 8).
    sub = max(C, 8)
    block_bytes = sub * TP * jnp.dtype(x_nchw.dtype).itemsize
    vmem_limit = int(min(max(6 * block_bytes + (2 << 20), 16 << 20), 64 << 20))

    cost = pl.CostEstimate(
        flops=int(4 * B * P * C * HID),
        transcendentals=int(B * P * HID),
        bytes_accessed=int(8 * B * C * P),
    )

    kernel = functools.partial(_score_kernel, chunk=chunk, n_chunks=n_chunks)

    out = pl.pallas_call(
        kernel,
        out_shape=jax.ShapeDtypeStruct((B, C, P), x_nchw.dtype),
        grid_spec=pltpu.PrefetchScalarGridSpec(
            num_scalar_prefetch=0,
            grid=grid,
            in_specs=[
                pl.BlockSpec((1, C, TP), lambda b, p: (b, 0, p)),       # x tile
                pl.BlockSpec((1, HID, 1), lambda b, p: (b, 0, 0)),      # bias
                pl.BlockSpec((HID, C), lambda b, p: (0, 0)),            # w1^T (resident)
                pl.BlockSpec((C, HID), lambda b, p: (0, 0)),            # w2^T (resident)
                pl.BlockSpec((C, 1), lambda b, p: (0, 0)),              # b2   (resident)
            ],
            out_specs=pl.BlockSpec((1, C, TP), lambda b, p: (b, 0, p)),
        ),
        compiler_params=pltpu.CompilerParams(
            dimension_semantics=("parallel", "parallel"),
            vmem_limit_bytes=vmem_limit,
        ),
        cost_estimate=cost,
    )(x_rows, bias, w1t, w2t, b2c)

    return out.reshape(B, C, H, W)


def init_params(key, channels, hidden, temb_dim):
    k1, k2, k3 = jax.random.split(key, 3)
    return {
        "w1": jax.random.normal(k1, (channels, hidden), jnp.float32) / math.sqrt(channels),
        "b1": jnp.zeros((hidden,), jnp.float32),
        "w2": jax.random.normal(k2, (hidden, channels), jnp.float32) / math.sqrt(hidden),
        "b2": jnp.zeros((channels,), jnp.float32),
        "wt": jax.random.normal(k3, (temb_dim, hidden), jnp.float32) / math.sqrt(temb_dim),
        "bt": jnp.zeros((hidden,), jnp.float32),
    }


def _reference(x_nchw, t, params):
    """Pure-JAX reference (natural NHWC orientation) for correctness checking."""
    B, C, H, W = x_nchw.shape
    half = params["wt"].shape[0] // 2
    freqs = jnp.exp(-math.log(10000.0) * jnp.arange(half, dtype=jnp.float32) / half)
    ang = t[:, None] * freqs[None, :]
    fourier = jnp.concatenate([jnp.sin(ang), jnp.cos(ang)], axis=-1)
    temb = fourier @ params["wt"] + params["bt"]                        # (B, HID)
    x_rows = jnp.transpose(x_nchw, (0, 2, 3, 1)).reshape(B, H * W, C)
    h = jnp.tanh(x_rows @ params["w1"] + params["b1"][None, None, :] + temb[:, None, :])
    y = h @ params["w2"] + params["b2"][None, None, :]
    return jnp.transpose(y.reshape(B, H, W, C), (0, 3, 1, 2))


if __name__ == "__main__":
    B, C, H, W = 2, 4, 16, 16
    HIDDEN = 32
    TEMB_DIM = 16

    key = jax.random.PRNGKey(0)
    kx, kt, kp = jax.random.split(key, 3)
    x_t = jax.random.normal(kx, (B, C, H, W), jnp.float32)
    t = jax.random.uniform(kt, (B,), jnp.float32)
    params = init_params(kp, C, HIDDEN, TEMB_DIM)

    out = score_estimator_forward(x_t, t, params)
    out = jax.block_until_ready(out)

    ref = _reference(x_t, t, params)
    assert out.shape == x_t.shape and out.dtype == x_t.dtype
    assert jnp.allclose(out, ref, atol=1e-5, rtol=1e-5)

    print("KERNEL_OK")
</pallas_src>

<mosaic_0001>
module attributes {stable_mosaic.version = 11 : i64} {
  func.func @_score_kernel(%arg0: i32, %arg1: i32, %arg2: memref<1x4x256xf32, #tpu.memory_space<vmem>>, %arg3: memref<1x32x1xf32, #tpu.memory_space<vmem>>, %arg4: memref<32x4xf32, #tpu.memory_space<vmem>>, %arg5: memref<4x32xf32, #tpu.memory_space<vmem>>, %arg6: memref<4x1xf32, #tpu.memory_space<vmem>>, %arg7: memref<1x4x256xf32, #tpu.memory_space<vmem>>) attributes {dimension_semantics = [#tpu.dimension_semantics<parallel>, #tpu.dimension_semantics<parallel>], iteration_bounds = array<i64: 2, 1>, scalar_prefetch = 0 : i64, scratch_operands = 0 : i64, tpu.core_type = #tpu.core_type<tc>, window_params = [{transform_indices = @transform_0, window_bounds = array<i64: 1, 4, 256>}, {transform_indices = @transform_1, window_bounds = array<i64: 1, 32, 1>}, {pipeline_mode = #tpu.pipeline_mode<synchronous>, transform_indices = @transform_2, window_bounds = array<i64: 32, 4>}, {pipeline_mode = #tpu.pipeline_mode<synchronous>, transform_indices = @transform_3, window_bounds = array<i64: 4, 32>}, {pipeline_mode = #tpu.pipeline_mode<synchronous>, transform_indices = @transform_4, window_bounds = array<i64: 4, 1>}, {transform_indices = @transform_5, window_bounds = array<i64: 1, 4, 256>}]} {
    %c0 = arith.constant 0 : index
    %c0_0 = arith.constant 0 : index
    %0 = vector.load %arg4[%c0, %c0_0] : memref<32x4xf32, #tpu.memory_space<vmem>>, vector<32x4xf32>
    %c0_1 = arith.constant 0 : index
    %c0_2 = arith.constant 0 : index
    %1 = vector.load %arg5[%c0_1, %c0_2] : memref<4x32xf32, #tpu.memory_space<vmem>>, vector<4x32xf32>
    %c0_3 = arith.constant 0 : index
    %c0_4 = arith.constant 0 : index
    %c0_5 = arith.constant 0 : index
    %2 = vector.load %arg3[%c0_3, %c0_4, %c0_5] : memref<1x32x1xf32, #tpu.memory_space<vmem>>, vector<1x32x1xf32>
    %3 = vector.shape_cast %2 : vector<1x32x1xf32> to vector<32x1xf32>
    %4 = vector.shape_cast %3 : vector<32x1xf32> to vector<32x1xf32>
    %5 = vector.broadcast %4 : vector<32x1xf32> to vector<32x256xf32>
    %c0_6 = arith.constant 0 : index
    %c0_7 = arith.constant 0 : index
    %6 = vector.load %arg6[%c0_6, %c0_7] : memref<4x1xf32, #tpu.memory_space<vmem>>, vector<4x1xf32>
    %7 = vector.shape_cast %6 : vector<4x1xf32> to vector<4x1xf32>
    %8 = vector.broadcast %7 : vector<4x1xf32> to vector<4x256xf32>
    %c0_i32 = arith.constant 0 : i32
    %9 = tpu.assume_multiple %c0_i32, 128 : i32
    %c0_8 = arith.constant 0 : index
    %c0_9 = arith.constant 0 : index
    %10 = arith.index_cast %9 : i32 to index
    %11 = vector.load %arg2[%c0_8, %c0_9, %10] : memref<1x4x256xf32, #tpu.memory_space<vmem>>, vector<1x4x256xf32>
    %12 = vector.shape_cast %11 : vector<1x4x256xf32> to vector<4x256xf32>
    %cst = arith.constant dense<0.000000e+00> : vector<32x256xf32>
    %13 = tpu.matmul %0, %12, %cst {dimension_numbers = #tpu.dot_dimension_numbers<[1], [0], [0], [1], [0, 0, 1, 1], [], []>} : vector<32x4xf32>, vector<4x256xf32>, vector<32x256xf32> -> vector<32x256xf32>
    %14 = arith.addf %13, %5 : vector<32x256xf32>
    %15 = math.tanh %14 : vector<32x256xf32>
    %cst_10 = arith.constant dense<0.000000e+00> : vector<4x256xf32>
    %16 = tpu.matmul %1, %15, %cst_10 {dimension_numbers = #tpu.dot_dimension_numbers<[1], [0], [0], [1], [0, 0, 1, 1], [], []>} : vector<4x32xf32>, vector<32x256xf32>, vector<4x256xf32> -> vector<4x256xf32>
    %17 = arith.addf %16, %8 : vector<4x256xf32>
    %c0_11 = arith.constant 0 : index
    %c0_12 = arith.constant 0 : index
    %18 = arith.index_cast %9 : i32 to index
    %19 = vector.load %arg7[%c0_11, %c0_12, %18] : memref<1x4x256xf32, #tpu.memory_space<vmem>>, vector<1x4x256xf32>
    %20 = vector.shape_cast %19 : vector<1x4x256xf32> to vector<4x256xf32>
    %21 = vector.shape_cast %17 : vector<4x256xf32> to vector<1x4x256xf32>
    tpu.vector_store %arg7[%c0_11, %c0_12, %18], %21 {strides = array<i32>} : memref<1x4x256xf32, #tpu.memory_space<vmem>>, vector<1x4x256xf32>,
    return
  }
  func.func @transform_0(%arg0: i32, %arg1: i32) -> (i32, i32, i32) {
    %c0_i32 = arith.constant 0 : i32
    %c0_i32_0 = arith.constant 0 : i32
    return %arg0, %c0_i32, %arg1 : i32, i32, i32
  }
  func.func @transform_1(%arg0: i32, %arg1: i32) -> (i32, i32, i32) {
    %c0_i32 = arith.constant 0 : i32
    %c0_i32_0 = arith.constant 0 : i32
    %c0_i32_1 = arith.constant 0 : i32
    return %arg0, %c0_i32, %c0_i32_0 : i32, i32, i32
  }
  func.func @transform_2(%arg0: i32, %arg1: i32) -> (i32, i32) {
    %c0_i32 = arith.constant 0 : i32
    %c0_i32_0 = arith.constant 0 : i32
    %c0_i32_1 = arith.constant 0 : i32
    return %c0_i32, %c0_i32_0 : i32, i32
  }
  func.func @transform_3(%arg0: i32, %arg1: i32) -> (i32, i32) {
    %c0_i32 = arith.constant 0 : i32
    %c0_i32_0 = arith.constant 0 : i32
    %c0_i32_1 = arith.constant 0 : i32
    return %c0_i32, %c0_i32_0 : i32, i32
  }
  func.func @transform_4(%arg0: i32, %arg1: i32) -> (i32, i32) {
    %c0_i32 = arith.constant 0 : i32
    %c0_i32_0 = arith.constant 0 : i32
    %c0_i32_1 = arith.constant 0 : i32
    return %c0_i32, %c0_i32_0 : i32, i32
  }
  func.func @transform_5(%arg0: i32, %arg1: i32) -> (i32, i32, i32) {
    %c0_i32 = arith.constant 0 : i32
    %c0_i32_0 = arith.constant 0 : i32
    return %arg0, %c0_i32, %arg1 : i32, i32, i32
  }
}

</mosaic_0001>

<bundles_post_ra>
// kernel: tpu_custom_call.1
= control target key start
LH: loop header
LB: loop body
LE: loop exit
PB: predicated region body
PF: predicated region fallthrough
CT: control target
= control target key end

     0   :  { %10 = vsyncpa [#allocation3], 0  ;;  %s948_s0 = inlined_call_operand.vmem [shape: f32[2,4,256], index: 0, kind: input, shape index: {}]   ;;  %s949_s1 = inlined_call_operand.vmem [shape: f32[2,32,1], index: 1, kind: input, shape index: {}]   ;;  %s950_s2 = inlined_call_operand.vmem [shape: f32[32,4], index: 2, kind: input, shape index: {}]   ;;  %s951_s3 = inlined_call_operand.vmem [shape: f32[4,32], index: 3, kind: input, shape index: {}]   ;;  %s952_s4 = inlined_call_operand.vmem [shape: f32[4,1], index: 4, kind: input, shape index: {}]   ;;  %s953_s5 = inlined_call_operand.hbm [shape: f32[2,4,256], index: 5, kind: output, shape index: {}]  }
   0x1   :  { %12 = vsyncpa [#allocation3 + $0x1], 0  ;;  %s824_s18 = smov 0   ;;  %s826_s19 = smov 0  }
   0x2   :  { %s828_s20 = smov 0   ;;  %s830_s21 = smov 0  }
   0x3   :  { %s832_s22 = smov 0   ;;  %s834_s23 = smov 0  }
   0x4 LB: > { %s612_s24 = sadd.s32 4294967295, %s789_s23   ;;  %s613_s25 = sadd.s32 4294967294, %s789_s23   ;;  %s789_s23 = sphi %s834_s23, %s18_s23   ;;  %s785_s22 = sphi %s832_s22, %s960_s22   ;;  %s781_s21 = sphi %s830_s21, %s959_s21   ;;  %s777_s20 = sphi %s828_s20, %s958_s20   ;;  %s773_s19 = sphi %s826_s19, %s957_s19   ;;  %s769_s18 = sphi %s824_s18, %s956_s18  }
   0x5   : > { %s30_s26 = sadd.s32 1, %s785_s22  ;;  %s156_s27 = sadd.s32 1, %s777_s20 }
   0x6   : > { %p32_p0 = scmp.ge.s32.totalorder %s30_s26, 2  ;;  %p166_p1 = scmp.ne.s32.totalorder %s777_s20, %s773_s19 }
   0x7   : > { %p167_p2 = scmp.eq.s32.totalorder %s612_s24, 1  ;;  %p172_p3 = scmp.ne.s32.totalorder %s773_s19, %s769_s18 }
   0x8   : > { %s962_s26 = smov (%p32_p0, %s30_s26), 0  ;;  %p173_p5 = scmp.eq.s32.totalorder %s613_s25, 1 }
   0x9   : > { %p864_p4 = por %p167_p2, %p166_p1  ;;  %s151_s29 = ssub.s32 %s785_s22, %s962_s26 }
   0xa   : > { %p616_p6 = scmp.ge.s32.totalorder %s789_s23, 1  ;;  %p154_p7 = scmp.eq.s32.totalorder %s151_s29, 0 }
   0xb   : > { %p871_p8 = por %p173_p5, %p172_p3  ;;  %p221_p9 = scmp.lt.s32.totalorder %s789_s23, 3 }
   0xc   : > { %s877_s6 = scalar_select %p154_p7, %s777_s20, %s156_s27  }
   0xd   : > { %p222_p10 = pnand %p616_p6, %p221_p9 }
   0xe   : > { %p259_p11 = scmp.lt.s32.totalorder (!%p222_p10), %s781_s21, 1  ;;  %s255_s13 = sand.u32 (!%p222_p10), 1, %s773_s19  }
   0xf   : > { %225 = sbr.rel (%p222_p10) target bundleno = 472 (0x1d8), region = 40  ;;  %s617_s14 = sshll.u32 (!%p222_p10), %s255_s13, 3 }
  0x10   : > { %s257_s16 = scalar_lea.vmem (!%p222_p10), [#allocation2], %s617_s14  ;;  %s508_s29 = scalar_lea.sflag (!%p222_p10), [#allocation3], %s255_s13 }
  0x11   : > { %s524_s17 = sshll.u32 (!%p222_p10), %s257_s16, 4  ;;  %s525_s17 = int_to_ptr.vmem [resolvable:$true] %s524_s17 }
  0x14   : > { %v791_v0 = vmov 0.0   ;;  %s260_s7 = scalar_select %p259_p11, %s781_s21, 1  ;;  %v792_v1 = vmov 0   ;;  %vm325_vm0 = vcmask 1043456   ;;  %v274_v6 = vld [vmem:[%s950_s2] sm:$0xff]  ;;  %vm312_vm1 = vcmask 31744  }
  0x15   : > { %394 = vmatprep.mubr.f32.mxu0 %v791_v0  ;;  %495 = vmatprep.mubr.f32.mxu1 %v791_v0  ;;  %v275_v9 = vld [vmem:[%s950_s2 + $0x8] sm:$0xff]  ;;  %v303_v10 = vld [vmem:[%s952_s4] sm:$0xf]  ;;  %v276_v11 = vld [vmem:[%s950_s2 + $0x10] sm:$0xff]  ;;  %vm427_vm2 = vcmask 261120  }
  0x16   : > { %695 = vset.pattern.permute.xlu1 %v792_v1  ;;  %694 = vset.pattern.permute.xlu0 %v792_v1  ;;  %s634_s8 = sshll.u32 %s260_s7, 3  ;;  %s635_s9 = sshll.u32 %s260_s7, 5  ;;  %v277_v12 = vld [vmem:[%s950_s2 + $0x18] sm:$0xff]  ;;  %v278_v40 = vld [vmem:[%s951_s3] sm:$0xf] }
  0x17   : > { %s266_s12 = scalar_lea.vmem %s948_s0, %s634_s8  ;;  %s272_s15 = scalar_lea.vmem %s949_s1, %s635_s9 }
  0x18   : > { %v309_v2 = vld [vmem:[%s266_s12] sm:$0xff]  ;;  %v280_v3 = vld [vmem:[%s272_s15 + $0x8] sm:$0xff]  ;;  %v282_v5 = vld [vmem:[%s272_s15 + $0x18] sm:$0xff]  ;;  %s713_s7 = scalar_lea.vmem %s525_s17, 128  ;;  %s793_s8 = smov [#allocation2]  }
  0x19   : > { %v311_v4 = vcombine.high %v309_v2, %v309_v2  ;;  %290 = vperm.xlu1 %695, %v280_v3   ;;  %v279_v7 = vld [vmem:[%s272_s15] sm:$0xff]  ;;  %300 = vperm.xlu0 %694, %v282_v5   ;;  %v281_v8 = vld [vmem:[%s272_s15 + $0x10] sm:$0xff]  ;;  %s636_s15 = sshll.u32 %s781_s21, 7  ;;  %p714_p12 = scmp.ne.s32.totalorder %s525_s17, %s713_s7 }
  0x1a   : > { %s522_s27 = scalar_lea.hbm %s953_s5, %s636_s15  ;;  %s717_s9 = sshll.u32 %s793_s8, 4  ;;  %s718_s9 = int_to_ptr.vmem [resolvable:$false] %s717_s9 }
  0x1b   : > { %622 = vmatprep.subr.msk.mxu0 %vm325_vm0, %v311_v4  ;;  %p715_p13 = pnand %p714_p12, %p864_p4  ;;  %s719_s21 = scalar_lea.vmem %s718_s9, 256 }
  0x1c   : > { %623 = vmatpush1.msk.msra.mxu0 %vm325_vm0, %v309_v2  ;;  %p720_p1 = scmp.lt.s32.totalorder %s525_s17, %s718_s9  ;;  %p721_p2 = scmp.lt.s32.totalorder %s719_s21, %s713_s7 }
  0x1d   : > { %624 = vmatmul.mubr.msk.f32.vlgmr.msra.gmra.mxu0 %vm312_vm1, %v274_v6  ;;  %285 = vperm.xlu1 %695, %v279_v7   ;;  %p716_p0 = pneg %p715_p13 }
  0x1e   : > { %400 = vmatprep.mubr.f32.mxu0 %v791_v0  ;;  %295 = vperm.xlu0 %694, %v281_v8   ;;  %p722_p3 = por %p721_p2, %p720_p1 }
  0x20   : > { %p723_p5 = pnand %p722_p3, %p716_p0 }
  0x21   : > { %625 = vmatmul.mubr.msk.f32.gmra.mxu0 %vm312_vm1, %v275_v9 }
  0x22   : > { %406 = vmatprep.mubr.f32.mxu0 %v791_v0  ;;  %306 = vperm.xlu0 %694, %v303_v10  }
  0x25   : > { %626 = vmatmul.mubr.msk.f32.gmra.mxu0 %vm312_vm1, %v276_v11 }
  0x26   : > { %412 = vmatprep.mubr.f32.mxu0 %v791_v0 }
  0x29   : > { %627 = vmatmul.mubr.msk.f32.gmra.mxu0 %vm312_vm1, %v277_v12 }
  0x94   : > { %v301_v17 = vpop.permute.xlu0 %300  ;;  %v291_v20 = vpop.permute.xlu1 %290 }
  0x98   : > { %v286_v28 = vpop.permute.xlu1 %285 }
  0x99   : > { %v296_v22 = vpop.permute.xlu0 %295 }
  0x9d   : > { %v307_v43 = vpop.permute.xlu0 %306 }
  0xdd   : > { %v396_v13 = vpop.f32.mrf.mxu0 }
  0xde   : > { %v397_v32 = vadd.f32 %v396_v13, %v286_v28 }
  0xdf   : > { %v398_v14 = vpop.f32.mrf.mxu0 }
  0xe0   : > { %v399_v31 = vadd.f32 %v398_v14, %v286_v28 }
  0xe1   : > { %v402_v15 = vpop.f32.mrf.mxu0 }
  0xe2   : > { %v403_v30 = vadd.f32 %v402_v15, %v291_v20 }
  0xe3   : > { %v404_v16 = vpop.f32.mrf.mxu0 }
  0xe4   : > { %v405_v29 = vadd.f32 %v404_v16, %v291_v20 }
  0xe5   : > { %v408_v18 = vpop.f32.mrf.mxu0 }
  0xe6   : > { %v409_v27 = vadd.f32 %v408_v18, %v296_v22 }
  0xe7   : > { %v410_v19 = vpop.f32.mrf.mxu0 }
  0xe8   : > { %v411_v25 = vadd.f32 %v410_v19, %v296_v22 }
  0xe9   : > { %v414_v21 = vpop.f32.mrf.mxu0 }
  0xea   : > { %v415_v23 = vadd.f32 %v414_v21, %v301_v17 }
  0xeb   : > { %v416_v24 = vpop.f32.mrf.mxu0 }
  0xec   : > { %v417_v26 = vadd.f32 %v416_v24, %v301_v17 }
  0xee   : > { %697 = vtanh.f32 %v417_v26 }
  0xef   : > { %699 = vtanh.f32 %v415_v23 }
  0xf0   : > { %701 = vtanh.f32 %v411_v25 }
  0xf1   : > { %703 = vtanh.f32 %v409_v27 }
  0xf2   : > { %705 = vtanh.f32 %v405_v29 }
  0xf3   : > { %707 = vtanh.f32 %v403_v30 }
  0xf4   : > { %709 = vtanh.f32 %v399_v31 }
  0xf5   : > { %711 = vtanh.f32 %v397_v32 }
  0xfb   : > { %v698_v33 = vpop.eup %697 }
  0xfc   : > { %v700_v34 = vpop.eup %699  ;;  %455 = vmatprep.subr.mxu1 %v698_v33 }
  0xfd   : > { %v702_v35 = vpop.eup %701  ;;  %456 = vmatpush1.msra.mxu1 %v700_v34 }
  0xfe   : > { %v704_v36 = vpop.eup %703  ;;  %457 = vmatprep.subr.mxu1 %v702_v35 }
  0xff   : > { %v706_v37 = vpop.eup %705  ;;  %458 = vmatpush1.msra.mxu1 %v704_v36 }
 0x100   : > { %v708_v38 = vpop.eup %707  ;;  %459 = vmatprep.subr.mxu1 %v706_v37 }
 0x101   : > { %v710_v39 = vpop.eup %709  ;;  %460 = vmatpush1.msra.mxu1 %v708_v38 }
 0x102   : > { %v712_v41 = vpop.eup %711  ;;  %461 = vmatprep.subr.mxu1 %v710_v39 }
 0x103   : > { %462 = vmatpush1.msra.mxu1 %v712_v41 }
 0x104   : > { %628 = vmatmul.mubr.msk.f32.vlgmr.msra.gmra.mxu1 %vm427_vm2, %v278_v40 }
 0x1c4   : > { %v497_v42 = vpop.f32.mrf.mxu1 }
 0x1c5   : > { %v498_v45 = vadd.f32 %v497_v42, %v307_v43 }
 0x1c6   : > { %v499_v44 = vpop.f32.mrf.mxu1 }
 0x1c7   : > { %v500_v46 = vadd.f32 %v499_v44, %v307_v43 }
 0x1c9   : > { %v504_v47 = vcombine.low %v498_v45, %v500_v46 }
 0x1cb   : > { %506 = vst [vmem:[%s257_s16] sm:$0xff] %v504_v47 }
 0x1cc   : > { %726 = shalt.err (!%p723_p5)
}
 0x1cd   : > { %s727_s10 = scalar_lea.hbm %s522_s27, 128  ;;  %s731_s13 = scalar_lea.hbm %s953_s5, 256 }
 0x1ce   : > { %p728_p6 = scmp.ne.s32.totalorder %s522_s27, %s727_s10  ;;  %p732_p10 = scmp.lt.s32.totalorder %s522_s27, %s953_s5 }
 0x1cf   : > { %p733_p11 = scmp.lt.s32.totalorder %s731_s13, %s727_s10 }
 0x1d0   : > { %p729_p7 = pnand %p728_p6, %p864_p4 }
 0x1d1   : > { %p734_p12 = por %p733_p11, %p732_p10 }
 0x1d2   : > { %p730_p9 = pneg %p729_p7 }
 0x1d4   : > { %p735_p13 = pnand %p734_p12, %p730_p9 }
 0x1d6   : > { %738 = shalt.err (!%p735_p13)
}
 0x1d7   : > { %637 = dma.vmem_to_hbm [thread:$0]  (%p864_p4), %s525_s17, 128, %s522_s27, %s508_s29  }
 0x1d8 PF: > { %p643_p0 = scmp.ge.s32.totalorder %s789_s23, 2  ;;  %s536_s16 = sand.u32 1, %s769_s18  }
 0x1d9   : > { %s537_s24 = scalar_lea.sflag [#allocation3], %s536_s16 }
 0x1da   : > { %p640_p1 = pnand %p643_p0, %p871_p8 }
 0x1dc   : > { %p641_p2 = pneg %p640_p1 }
 0x1de   : > { %764 = dma.done.wait (%p641_p2), %s537_s24, 128  }
 0x1df   : > { %766 = vsyncadd (%p641_p2), %s537_s24, 4294967168  ;;  %s18_s23 = sadd.s32 1, %s789_s23   ;;  %s956_s18 = smov %s773_s19 }
 0x1e0   : > { %p15_p3 = scmp.ge.s32.totalorder %s18_s23, 4   ;;  %s957_s19 = smov %s777_s20 }
 0x1e1   : > { %s958_s20 = smov %s877_s6  ;;  %s959_s21 = smov %s785_s22 }
 0x1e2   : > { %s960_s22 = smov %s962_s26  ;;  %17 = sbr.rel (!%p15_p3) target bundleno = 4 (0x4), region = 78 }
 0x1e7   :  { %542 = vsyncpa [#allocation3], 1 }
 0x1e8   :  { %544 = vsyncpa [#allocation3 + $0x1], 1 }

</bundles_post_ra>
